<compile_context>
chip_gen: v7x
topology: tpu7x:2x2x1
jax: 0.10.0
libtpu: 0.0.40
codegen_flags: <defaults>
</compile_context>

<pallas_src>
import jax
import jax.numpy as jnp
from jax import lax
from jax.experimental import pallas as pl
from jax.experimental.pallas import tpu as pltpu


def _linear_kernel(x_ref, w_ref, b_ref, o_ref):
    # x_ref: (TB, F) VMEM | w_ref: (1, F) VMEM | b_ref: (1, 1) SMEM | o_ref: (1, TB) VMEM
    acc = lax.dot_general(
        w_ref[...], x_ref[...],
        dimension_numbers=(((1,), (1,)), ((), ())),   # contract F with F -> (1, TB)
        preferred_element_type=jnp.float32,
    )
    o_ref[...] = (acc + b_ref[0, 0]).astype(o_ref.dtype)


def _pick_batch_tile(B, F, itemsize, budget_bytes):
    """Largest multiple-of-128 row tile whose lane-padded footprint <= budget."""
    f_lanes = pl.cdiv(F, 128) * 128               # F<128 still occupies 128 lanes
    rows = (budget_bytes // (f_lanes * itemsize)) // 128 * 128
    rows = max(128, rows)
    if B <= rows:
        return B                                  # single block: dims == full array dims
    return rows


def linear_net_forward(x, weight, bias, *, tile_budget_bytes=4 * 1024 * 1024):
    """y = x @ weight.T + bias   (weight: (1, F), bias: (1,)) -> (B, 1)"""
    B, F = x.shape
    TB = _pick_batch_tile(B, F, x.dtype.itemsize, tile_budget_bytes)
    grid = (pl.cdiv(B, TB),)

    w2d = weight.reshape(1, F)                    # natural (1, F) layout, stays resident
    b2d = bias.reshape(1, 1).astype(jnp.float32)  # scalar in SMEM

    cost = pl.CostEstimate(
        flops=2 * B * F,
        transcendentals=0,
        bytes_accessed=(B * F + F) * x.dtype.itemsize + B * x.dtype.itemsize,
    )

    y_row = pl.pallas_call(
        _linear_kernel,
        out_shape=jax.ShapeDtypeStruct((1, B), x.dtype),
        grid=grid,
        in_specs=[
            pl.BlockSpec((TB, F), lambda i: (i, 0)),            # x: batch-tiled
            pl.BlockSpec((1, F), lambda i: (0, 0)),             # weight: resident
            pl.BlockSpec(memory_space=pltpu.MemorySpace.SMEM),  # bias: SMEM scalar
        ],
        out_specs=pl.BlockSpec((1, TB), lambda i: (0, i)),      # lane-dense output
        compiler_params=pltpu.CompilerParams(
            dimension_semantics=("parallel",),
        ),
        cost_estimate=cost,
    )(x, w2d, b2d)

    return y_row.reshape(B, 1)                    # back to PyTorch's (B, 1)


if __name__ == "__main__":
    # Small shapes consistent with the module: batch=8, n_feature=32
    batch, n_feature = 8, 32

    key = jax.random.PRNGKey(0)
    kx, kw, kb = jax.random.split(key, 3)

    x = jax.random.normal(kx, (batch, n_feature), dtype=jnp.float32)

    # nn.Linear(n_feature, 1): weight (1, n_feature), bias (1,)
    bound = 1.0 / (n_feature ** 0.5)
    weight = jax.random.uniform(kw, (1, n_feature), jnp.float32, -bound, bound)
    bias = jax.random.uniform(kb, (1,), jnp.float32, -bound, bound)

    y = linear_net_forward(x, weight, bias)
    y = jax.block_until_ready(y)

    y_ref = x @ weight.T + bias
    assert y.shape == (batch, 1)
    assert jnp.allclose(y, y_ref, atol=1e-5, rtol=1e-5)

    # Second check: exercise the multi-block tiled path (incl. a partial tail
    # block) by forcing a small per-buffer budget -> TB=128, grid=(3,).
    B2, F2 = 300, 256
    k2x, k2w, k2b = jax.random.split(jax.random.PRNGKey(1), 3)
    x2 = jax.random.normal(k2x, (B2, F2), dtype=jnp.float32)
    w2 = jax.random.uniform(k2w, (1, F2), jnp.float32, -0.1, 0.1)
    b2 = jax.random.uniform(k2b, (1,), jnp.float32, -0.1, 0.1)
    y2 = jax.block_until_ready(
        linear_net_forward(x2, w2, b2, tile_budget_bytes=128 * 256 * 4)
    )
    y2_ref = x2 @ w2.T + b2
    assert y2.shape == (B2, 1)
    assert jnp.allclose(y2, y2_ref, atol=1e-4, rtol=1e-4)

    print("KERNEL_OK")
</pallas_src>

<mosaic_0001>
module attributes {stable_mosaic.version = 11 : i64} {
  func.func @_linear_kernel(%arg0: i32, %arg1: memref<8x32xf32, #tpu.memory_space<vmem>>, %arg2: memref<1x32xf32, #tpu.memory_space<vmem>>, %arg3: memref<1x1xf32, #tpu.memory_space<smem>>, %arg4: memref<1x8xf32, #tpu.memory_space<vmem>>) attributes {dimension_semantics = [#tpu.dimension_semantics<parallel>], iteration_bounds = array<i64: 1>, scalar_prefetch = 0 : i64, scratch_operands = 0 : i64, tpu.core_type = #tpu.core_type<tc>, window_params = [{transform_indices = @transform_0, window_bounds = array<i64: 8, 32>}, {pipeline_mode = #tpu.pipeline_mode<synchronous>, transform_indices = @transform_1, window_bounds = array<i64: 1, 32>}, {transform_indices = @transform_2, window_bounds = array<i64: 1, 1>}, {transform_indices = @transform_3, window_bounds = array<i64: 1, 8>}]} {
    %c0 = arith.constant 0 : index
    %c0_0 = arith.constant 0 : index
    %0 = vector.load %arg2[%c0, %c0_0] : memref<1x32xf32, #tpu.memory_space<vmem>>, vector<1x32xf32>
    %c0_1 = arith.constant 0 : index
    %c0_2 = arith.constant 0 : index
    %1 = vector.load %arg1[%c0_1, %c0_2] : memref<8x32xf32, #tpu.memory_space<vmem>>, vector<8x32xf32>
    %cst = arith.constant dense<0.000000e+00> : vector<1x8xf32>
    %2 = tpu.matmul %0, %1, %cst {dimension_numbers = #tpu.dot_dimension_numbers<[1], [1], [0], [0], [0, 0, 1, 0], [], []>} : vector<1x32xf32>, vector<8x32xf32>, vector<1x8xf32> -> vector<1x8xf32>
    %c0_3 = arith.constant 0 : index
    %c0_4 = arith.constant 0 : index
    %3 = memref.load %arg3[%c0_3, %c0_4] : memref<1x1xf32, #tpu.memory_space<smem>>
    %4 = vector.broadcast %3 : f32 to vector<1x8xf32>
    %5 = arith.addf %2, %4 : vector<1x8xf32>
    %c0_5 = arith.constant 0 : index
    %c0_6 = arith.constant 0 : index
    %6 = vector.load %arg4[%c0_5, %c0_6] : memref<1x8xf32, #tpu.memory_space<vmem>>, vector<1x8xf32>
    tpu.vector_store %arg4[%c0_5, %c0_6], %5 {strides = array<i32>} : memref<1x8xf32, #tpu.memory_space<vmem>>, vector<1x8xf32>,
    return
  }
  func.func @transform_0(%arg0: i32) -> (i32, i32) {
    %c0_i32 = arith.constant 0 : i32
    %c0_i32_0 = arith.constant 0 : i32
    return %arg0, %c0_i32 : i32, i32
  }
  func.func @transform_1(%arg0: i32) -> (i32, i32) {
    %c0_i32 = arith.constant 0 : i32
    %c0_i32_0 = arith.constant 0 : i32
    %c0_i32_1 = arith.constant 0 : i32
    return %c0_i32, %c0_i32_0 : i32, i32
  }
  func.func @transform_2(%arg0: i32) -> (i32, i32) {
    %c0_i32 = arith.constant 0 : i32
    %c0_i32_0 = arith.constant 0 : i32
    %c0_i32_1 = arith.constant 0 : i32
    return %c0_i32, %c0_i32_0 : i32, i32
  }
  func.func @transform_3(%arg0: i32) -> (i32, i32) {
    %c0_i32 = arith.constant 0 : i32
    %c0_i32_0 = arith.constant 0 : i32
    return %c0_i32, %arg0 : i32, i32
  }
}

</mosaic_0001>

<bundles_post_ra>
// kernel: tpu_custom_call.1
= control target key start
LH: loop header
LB: loop body
LE: loop exit
PB: predicated region body
PF: predicated region fallthrough
CT: control target
= control target key end

     0   :  { %9 = vsyncpa [#allocation4], 0  ;;  %s241_s0 = inlined_call_operand.hbm [shape: f32[8,32], index: 0, kind: input, shape index: {}]   ;;  %s242_s1 = inlined_call_operand.vmem [shape: f32[1,32], index: 1, kind: input, shape index: {}]   ;;  %s243_s2 = inlined_call_operand.<no memory space> [shape: f32[1,1], index: 2, kind: input, shape index: {}]   ;;  %s244_s3 = inlined_call_operand.hbm [shape: f32[1,8], index: 3, kind: output, shape index: {}]  }
   0x1   :  { %10 = vsyncpa [#allocation5], 0  ;;  %s187_s12 = smov [#allocation3]   ;;  %s139_s16 = scalar_lea.hbm %s241_s0, 128 }
   0x2   :  { %s17_s13 = sshll.u32 %s187_s12, 4  ;;  %p140_p0 = scmp.ne.s32.totalorder %s241_s0, %s139_s16  ;;  %s18_s13 = int_to_ptr.vmem [resolvable:$true] %s17_s13 }
   0x3   :  { %p143_p1 = scmp.lt.u32.totalorder %s139_s16, %s241_s0 }
   0x5   :  { %p145_p2 = pnand %p143_p1, %p140_p0 }
   0x7   :  { %148 = shalt.err (!%p145_p2)
}
   0x8   :  { %s149_s21 = scalar_lea.vmem %s18_s13, 128  ;;  %p154_p4 = scmp.lt.s32.totalorder %s18_s13, %s18_s13 }
   0x9   :  { %p150_p3 = scmp.ne.s32.totalorder %s18_s13, %s149_s21  ;;  %p155_p5 = scmp.lt.s32.totalorder %s149_s21, %s149_s21 }
   0xb   :  { %p156_p6 = por %p155_p5, %p154_p4 }
   0xd   :  { %p157_p7 = pnand %p156_p6, %p150_p3 }
   0xf   :  { %160 = shalt.err (!%p157_p7)
}
  0x10   :  { %20 = dma.hbm_to_vmem [thread:$0]  %s241_s0, 128, %s18_s13, [#allocation4]  }
  0x11   :  { %183 = dma.done.wait [#allocation4], 128  }
  0x12   :  { %184 = vsyncadd [#allocation4], 4294967168  ;;  %v188_v0 = vmov 0.0   ;;  %vm189_vm0 = vmmov 0   ;;  %vm32_vm1 = vcmask 261120   ;;  %v29_v1 = vld [vmem:[#allocation3] sm:$0xff]  ;;  %v31_v3 = vstv %s243_s2 }
  0x13   :  { %130 = vmatprep.subr.mxu0 %v188_v0  ;;  %132 = vmatprep.mubr.msk.f32.mxu0 %vm189_vm0, %v188_v0  ;;  %v28_v2 = vld [vmem:[%s242_s1] sm:$0x1]  ;;  %s190_s28 = smov [#allocation6]   ;;  %vm109_vm2 = vcmask 57344  }
  0x14   :  { %131 = vmatpush3.xpose.msk.msra.mxu0 %vm32_vm1, %v29_v1  ;;  %s117_s0 = sshll.u32 %s190_s28, 4  ;;  %s118_s0 = int_to_ptr.vmem [resolvable:$true] %s117_s0 }
  0x15   :  { %s161_s29 = scalar_lea.vmem %s118_s0, 16  ;;  %s165_s30 = scalar_lea.vmem %s118_s0, 32 }
  0x16   :  { %p162_p8 = scmp.ne.s32.totalorder %s118_s0, %s161_s29  ;;  %p166_p9 = scmp.lt.s32.totalorder %s118_s0, %s118_s0 }
  0x17   :  { %133 = vmatmul.mubr.msk.f32.vlgmr.msra.gmra.mrb[0].mxu0 %vm32_vm1, %v28_v2  ;;  %p167_p10 = scmp.lt.s32.totalorder %s165_s30, %s161_s29 }
  0x19   :  { %p168_p11 = por %p167_p10, %p166_p9 }
  0x1b   :  { %p169_p12 = pnand %p168_p11, %p162_p8 }
  0xea   :  { %v105_v4 = vpop.f32.mrb[0].mxu0 }
  0xeb   :  { %v106_v5 = vadd.f32 %v105_v4, %v31_v3  ;;  %v134_v6 = vpop.f32.mrb[1].mxu0 }
  0xed   :  { %110 = vst.msk [vmem:[#allocation6] sm:$0x1] %vm109_vm2, %v106_v5 }
  0xee   :  { %172 = shalt.err (!%p169_p12)
}
  0xef   :  { %s173_s2 = scalar_lea.hbm %s244_s3, 16 }
  0xf0   :  { %p174_p13 = scmp.ne.s32.totalorder %s244_s3, %s173_s2  ;;  %p177_p0 = scmp.lt.u32.totalorder %s173_s2, %s244_s3 }
  0xf2   :  { %p179_p1 = pnand %p177_p0, %p174_p13 }
  0xf4   :  { %182 = shalt.err (!%p179_p1)
}
  0xf5   :  { %120 = dma.vmem_to_hbm [thread:$0]  %s118_s0, 16, %s244_s3, [#allocation5]  }
  0xf6   :  { %185 = dma.done.wait [#allocation5], 16  }
  0xf7   :  { %186 = vsyncadd [#allocation5], 4294967280 }
  0xf8   :  { %124 = vsyncpa [#allocation4], 1 }
  0xf9   :  { %125 = vsyncpa [#allocation5], 1 }

</bundles_post_ra>
